<compile_context>
chip_gen: v5e
topology: v5e:2x2
jax: 0.10.0
libtpu: 0.0.40
codegen_flags: <defaults>
</compile_context>

<pallas_src>
import jax
import jax.numpy as jnp
from jax.experimental import pallas as pl
from jax.experimental.pallas import tpu as pltpu


def _make_kernel(has_bias):
    def kernel(*refs):
        if has_bias:
            x_ref, w_ref, b_ref, o_ref, acc_ref = refs
        else:
            x_ref, w_ref, o_ref, acc_ref = refs
            b_ref = None

        k = pl.program_id(2)

        @pl.when(k == 0)
        def _init():
            acc_ref[...] = jnp.zeros_like(acc_ref)

        acc_ref[...] += jnp.dot(
            x_ref[...], w_ref[...], preferred_element_type=jnp.float32)

        @pl.when(k == pl.num_programs(2) - 1)
        def _finalize():
            acc = acc_ref[...]
            if has_bias:
                acc = acc + b_ref[...].astype(jnp.float32)
            o_ref[...] = acc.astype(o_ref.dtype)

    return kernel


def _round_up(x, mult):
    return ((x + mult - 1) // mult) * mult


def _pick_tk(dim_input, tk_default):
    """Pick a K tile that is a multiple of 128 and divides dim_input exactly."""
    if dim_input <= tk_default:
        return dim_input
    for cand in (tk_default, 384, 256, 128):
        if cand <= tk_default and dim_input % cand == 0:
            return cand
    # TODO(synk): in-kernel masking of a ragged last K block; for now fall back
    # to a whole-K tile (correct, just more VMEM for unusual dim_input).
    return dim_input


def head_split(x, weight, bias, num_head, dim_key, *,
               tm=256, tn=512, tk=512, compute_dtype=None):
    """Pallas implementation of HeadSplit.forward.

    Args:
      x:      [..., dim_input]
      weight: [dim_input, num_head * dim_key]   (transposed torch layout)
      bias:   [num_head * dim_key] or None
      num_head, dim_key: head split dims.
      compute_dtype: optional dtype (e.g. jnp.bfloat16) for x/weight on the MXU;
        accumulation stays f32, output keeps x.dtype.

    Returns:
      [..., num_head, dim_key]
    """
    head_shape = x.shape[:-1]
    dim_input = x.shape[-1]
    n_out = num_head * dim_key
    assert weight.shape == (dim_input, n_out)

    out_dtype = x.dtype
    x2d = x.reshape(-1, dim_input)          # metadata-only reshape
    m = x2d.shape[0]

    if compute_dtype is not None:
        x2d = x2d.astype(compute_dtype)
        weight = weight.astype(compute_dtype)

    # Clamp tiles to the problem while respecting TPU layout rules:
    # second-to-last block dim multiple of 8 (or full extent),
    # last block dim multiple of 128 (or full extent).
    tm = min(tm, _round_up(m, 8))
    tn = n_out if n_out <= tn else tn       # default tn is a multiple of 128
    tk = _pick_tk(dim_input, tk)

    grid = (pl.cdiv(m, tm), pl.cdiv(n_out, tn), pl.cdiv(dim_input, tk))

    has_bias = bias is not None
    in_specs = [
        pl.BlockSpec((tm, tk), lambda i, j, k: (i, k)),
        pl.BlockSpec((tk, tn), lambda i, j, k: (k, j)),
    ]
    operands = [x2d, weight]
    if has_bias:
        b2d = bias.reshape(1, n_out)        # keep original (f32) precision
        in_specs.append(pl.BlockSpec((1, tn), lambda i, j, k: (0, j)))
        operands.append(b2d)

    # Advisory cost estimate for XLA scheduling around the custom call.
    bytes_accessed = (x2d.size * x2d.dtype.itemsize
                      + weight.size * weight.dtype.itemsize
                      + m * n_out * jnp.dtype(out_dtype).itemsize
                      + (n_out * b2d.dtype.itemsize if has_bias else 0))
    cost = pl.CostEstimate(flops=2 * m * dim_input * n_out,
                           transcendentals=0,
                           bytes_accessed=bytes_accessed)

    # Explicit VMEM budget: double-buffered tiles + accumulator, 2x headroom,
    # capped safely below v7x's 64 MiB per-core VMEM.
    vmem_need = (2 * tm * tk * x2d.dtype.itemsize
                 + 2 * tk * tn * weight.dtype.itemsize
                 + 2 * tm * tn * jnp.dtype(out_dtype).itemsize
                 + tm * tn * 4
                 + (2 * tn * b2d.dtype.itemsize if has_bias else 0))
    vmem_limit = int(min(max(2 * vmem_need, 16 * 1024 * 1024),
                         48 * 1024 * 1024))

    out2d = pl.pallas_call(
        _make_kernel(has_bias),
        out_shape=jax.ShapeDtypeStruct((m, n_out), out_dtype),
        grid_spec=pltpu.PrefetchScalarGridSpec(
            num_scalar_prefetch=0,
            grid=grid,
            in_specs=in_specs,
            out_specs=pl.BlockSpec((tm, tn), lambda i, j, k: (i, j)),
            scratch_shapes=[pltpu.VMEM((tm, tn), jnp.float32)],
        ),
        compiler_params=pltpu.CompilerParams(
            dimension_semantics=("parallel", "parallel", "arbitrary"),
            vmem_limit_bytes=vmem_limit,
        ),
        cost_estimate=cost,
    )(*operands)

    # Final head split is pure metadata; stays in plain JAX.
    return out2d.reshape(*head_shape, num_head, dim_key)


if __name__ == "__main__":
    # Small shapes consistent with the module's forward:
    #   input [batch, seq, dim_input] -> output [batch, seq, num_head, dim_key]
    batch, seq = 2, 8
    dim_input, num_head, dim_key = 32, 4, 16
    use_bias = True

    key = jax.random.PRNGKey(0)
    kx, kw, kb, kx2, kw2 = jax.random.split(key, 5)

    x = jax.random.normal(kx, (batch, seq, dim_input), dtype=jnp.float32)
    bound = 1.0 / (dim_input ** 0.5)
    weight = jax.random.uniform(
        kw, (dim_input, num_head * dim_key), dtype=jnp.float32,
        minval=-bound, maxval=bound)
    bias = jax.random.uniform(
        kb, (num_head * dim_key,), dtype=jnp.float32,
        minval=-bound, maxval=bound) if use_bias else None

    out = head_split(x, weight, bias, num_head, dim_key)
    out = jax.block_until_ready(out)

    ref = (jnp.dot(x.reshape(-1, dim_input), weight,
                   precision=jax.lax.Precision.HIGHEST) + bias
           ).reshape(batch, seq, num_head, dim_key)
    assert out.shape == (batch, seq, num_head, dim_key)
    assert jnp.allclose(out, ref, atol=2e-5, rtol=2e-5)

    # Second check exercising the tiled path: ragged M block, K-axis reduction
    # with the f32 accumulator, no bias.
    b2, s2, d2, h2, dk2 = 3, 100, 1024, 6, 64
    x2 = jax.random.normal(kx2, (b2, s2, d2), dtype=jnp.float32)
    bound2 = 1.0 / (d2 ** 0.5)
    w2 = jax.random.uniform(kw2, (d2, h2 * dk2), dtype=jnp.float32,
                            minval=-bound2, maxval=bound2)
    out2 = jax.block_until_ready(head_split(x2, w2, None, h2, dk2))
    ref2 = jnp.dot(x2.reshape(-1, d2), w2,
                   precision=jax.lax.Precision.HIGHEST).reshape(b2, s2, h2, dk2)
    assert out2.shape == (b2, s2, h2, dk2)
    assert jnp.allclose(out2, ref2, atol=1e-4, rtol=1e-4)

    print("KERNEL_OK")
</pallas_src>

<mosaic_0001>
module attributes {stable_mosaic.version = 11 : i64} {
  func.func @kernel(%arg0: i32, %arg1: i32, %arg2: i32, %arg3: memref<16x32xf32, #tpu.memory_space<vmem>>, %arg4: memref<32x64xf32, #tpu.memory_space<vmem>>, %arg5: memref<1x64xf32, #tpu.memory_space<vmem>>, %arg6: memref<16x64xf32, #tpu.memory_space<vmem>>, %arg7: memref<16x64xf32, #tpu.memory_space<vmem>>) attributes {dimension_semantics = [#tpu.dimension_semantics<parallel>, #tpu.dimension_semantics<parallel>, #tpu.dimension_semantics<arbitrary>], iteration_bounds = array<i64: 1, 1, 1>, scalar_prefetch = 0 : i64, scratch_operands = 1 : i64, tpu.core_type = #tpu.core_type<tc>, window_params = [{transform_indices = @transform_0, window_bounds = array<i64: 16, 32>}, {transform_indices = @transform_1, window_bounds = array<i64: 32, 64>}, {transform_indices = @transform_2, window_bounds = array<i64: 1, 64>}, {transform_indices = @transform_3, window_bounds = array<i64: 16, 64>}]} {
    %c0_i32 = arith.constant 0 : i32
    %0 = arith.cmpi eq, %arg2, %c0_i32 : i32
    %1 = arith.extui %0 : i1 to i32
    %c0_i32_0 = arith.constant 0 : i32
    %2 = arith.cmpi ne, %1, %c0_i32_0 : i32
    scf.if %2 {
      %cst_10 = arith.constant 0.000000e+00 : f32
      %12 = vector.broadcast %cst_10 : f32 to vector<16x64xf32>
      %c0_11 = arith.constant 0 : index
      %c0_12 = arith.constant 0 : index
      %13 = vector.load %arg7[%c0_11, %c0_12] : memref<16x64xf32, #tpu.memory_space<vmem>>, vector<16x64xf32>
      tpu.vector_store %arg7[%c0_11, %c0_12], %12 {strides = array<i32>} : memref<16x64xf32, #tpu.memory_space<vmem>>, vector<16x64xf32>,
    } else {
    }
    %c0 = arith.constant 0 : index
    %c0_1 = arith.constant 0 : index
    %3 = vector.load %arg7[%c0, %c0_1] : memref<16x64xf32, #tpu.memory_space<vmem>>, vector<16x64xf32>
    %c0_2 = arith.constant 0 : index
    %c0_3 = arith.constant 0 : index
    %4 = vector.load %arg3[%c0_2, %c0_3] : memref<16x32xf32, #tpu.memory_space<vmem>>, vector<16x32xf32>
    %c0_4 = arith.constant 0 : index
    %c0_5 = arith.constant 0 : index
    %5 = vector.load %arg4[%c0_4, %c0_5] : memref<32x64xf32, #tpu.memory_space<vmem>>, vector<32x64xf32>
    %cst = arith.constant dense<0.000000e+00> : vector<16x64xf32>
    %6 = tpu.matmul %4, %5, %cst {dimension_numbers = #tpu.dot_dimension_numbers<[1], [0], [0], [1], [0, 0, 1, 1], [], []>} : vector<16x32xf32>, vector<32x64xf32>, vector<16x64xf32> -> vector<16x64xf32>
    %7 = arith.addf %3, %6 : vector<16x64xf32>
    %c0_6 = arith.constant 0 : index
    %c0_7 = arith.constant 0 : index
    %8 = vector.load %arg7[%c0_6, %c0_7] : memref<16x64xf32, #tpu.memory_space<vmem>>, vector<16x64xf32>
    tpu.vector_store %arg7[%c0_6, %c0_7], %7 {strides = array<i32>} : memref<16x64xf32, #tpu.memory_space<vmem>>, vector<16x64xf32>,
    %c0_i32_8 = arith.constant 0 : i32
    %9 = arith.cmpi eq, %arg2, %c0_i32_8 : i32
    %10 = arith.extui %9 : i1 to i32
    %c0_i32_9 = arith.constant 0 : i32
    %11 = arith.cmpi ne, %10, %c0_i32_9 : i32
    scf.if %11 {
      %c0_10 = arith.constant 0 : index
      %c0_11 = arith.constant 0 : index
      %12 = vector.load %arg7[%c0_10, %c0_11] : memref<16x64xf32, #tpu.memory_space<vmem>>, vector<16x64xf32>
      %c0_12 = arith.constant 0 : index
      %c0_13 = arith.constant 0 : index
      %13 = vector.load %arg5[%c0_12, %c0_13] : memref<1x64xf32, #tpu.memory_space<vmem>>, vector<1x64xf32>
      %14 = vector.broadcast %13 : vector<1x64xf32> to vector<16x64xf32>
      %15 = arith.addf %12, %14 : vector<16x64xf32>
      %c0_14 = arith.constant 0 : index
      %c0_15 = arith.constant 0 : index
      %16 = vector.load %arg6[%c0_14, %c0_15] : memref<16x64xf32, #tpu.memory_space<vmem>>, vector<16x64xf32>
      tpu.vector_store %arg6[%c0_14, %c0_15], %15 {strides = array<i32>} : memref<16x64xf32, #tpu.memory_space<vmem>>, vector<16x64xf32>,
    } else {
    }
    return
  }
  func.func @transform_0(%arg0: i32, %arg1: i32, %arg2: i32) -> (i32, i32) {
    %c0_i32 = arith.constant 0 : i32
    return %arg0, %arg2 : i32, i32
  }
  func.func @transform_1(%arg0: i32, %arg1: i32, %arg2: i32) -> (i32, i32) {
    %c0_i32 = arith.constant 0 : i32
    return %arg2, %arg1 : i32, i32
  }
  func.func @transform_2(%arg0: i32, %arg1: i32, %arg2: i32) -> (i32, i32) {
    %c0_i32 = arith.constant 0 : i32
    %c0_i32_0 = arith.constant 0 : i32
    return %c0_i32, %arg1 : i32, i32
  }
  func.func @transform_3(%arg0: i32, %arg1: i32, %arg2: i32) -> (i32, i32) {
    %c0_i32 = arith.constant 0 : i32
    return %arg0, %arg1 : i32, i32
  }
}

</mosaic_0001>

<bundles_post_ra>
// kernel: tpu_custom_call.1
= control target key start
LH: loop header
LB: loop body
LE: loop exit
PB: predicated region body
PF: predicated region fallthrough
CT: control target
= control target key end

     0   :  { %8 = vsyncpa [#allocation4], 0  ;;  %s274_s0 = inlined_call_operand.hbm [shape: f32[16,32], index: 0, kind: input, shape index: {}]   ;;  %s275_s1 = inlined_call_operand.hbm [shape: f32[32,64], index: 1, kind: input, shape index: {}]   ;;  %s276_s2 = inlined_call_operand.vmem [shape: f32[1,64], index: 2, kind: input, shape index: {}]   ;;  %s277_s3 = inlined_call_operand.hbm [shape: f32[16,64], index: 3, kind: output, shape index: {}]  }
   0x1   :  { %9 = vsyncpa [#allocation7], 0 }
   0x2   :  { %10 = vsyncpa [#allocation5], 0  ;;  %s15_s14 = sshll.u32 %s274_s0, 4  ;;  %s221_s15 = smov [#allocation3]   ;;  %s16_s14 = int_to_ptr.hbm [resolvable:$true] %s15_s14 }
   0x3   :  { %s17_s16 = sshll.u32 %s221_s15, 4  ;;  %s28_s19 = sshll.u32 %s275_s1, 4  ;;  %s18_s16 = int_to_ptr.vmem [resolvable:$true] %s17_s16  ;;  %s29_s19 = int_to_ptr.hbm [resolvable:$true] %s28_s19 }
   0x4   :  { %s222_s20 = smov 128   ;;  %s223_s21 = smov 8  }
   0x5   :  { %23 = dma.hbm_to_vmem [thread:$0]  %s16_s14, 256, %s18_s16, [#allocation4], %s222_s20, %s222_s20, %s223_s21  }
   0x6   :  { %s224_s22 = smov [#allocation6]  }
   0x7   :  { %s30_s23 = sshll.u32 %s224_s22, 4  ;;  %s31_s23 = int_to_ptr.vmem [resolvable:$true] %s30_s23 }
   0x8   :  { %36 = dma.hbm_to_vmem [thread:$0]  %s29_s19, 512, %s31_s23, [#allocation7], %s222_s20, %s222_s20, %s223_s21  }
   0x9   :  { %215 = dma.done.wait [#allocation4], 256  }
   0xa   :  { %216 = vsyncadd [#allocation4], 4294967040 }
   0xb   :  { %217 = dma.done.wait [#allocation7], 512  }
   0xc   :  { %218 = vsyncadd [#allocation7], 4294966784  ;;  %vm51_vm0 = vcmask 523264   ;;  %v225_v0 = vmov 0.0   ;;  %v61_v1 = vld [vmem:[#allocation6 + $0x18] sm:$0xff]  ;;  %v60_v2 = vld [vmem:[#allocation6 + $0x10] sm:$0xff] }
   0xd   :  { %52 = vst.msk [vmem:[#allocation2] sm:$0xff] %vm51_vm0, %v225_v0  ;;  %81 = vmatpush.msra.mxu0 %v61_v1  ;;  %132 = vmatpush.msra.mxu1 %v61_v1  ;;  %v59_v3 = vld [vmem:[#allocation6 + $0x8] sm:$0xff]  ;;  %v58_v4 = vld [vmem:[#allocation6] sm:$0xff]  ;;  %v56_v5 = vld [vmem:[#allocation3] sm:$0xff]  ;;  %vm62_vm1 = vcmask 261120   ;;  %s226_s24 = smov [#allocation8]  }
   0xe   :  { %53 = vst.msk [vmem:[#allocation2 + $0x8] sm:$0xff] %vm51_vm0, %v225_v0  ;;  %v57_v6 = vld [vmem:[#allocation3 + $0x8] sm:$0xff]  ;;  %v142_v13 = vld [vmem:[%s276_s2] ss:$0 sm:$0xff]  ;;  %s114_s25 = sshll.u32 %s226_s24, 4  ;;  %s116_s28 = sshll.u32 %s277_s3, 4  ;;  %s115_s25 = int_to_ptr.vmem [resolvable:$true] %s114_s25  ;;  %s117_s28 = int_to_ptr.hbm [resolvable:$true] %s116_s28 }
   0xf   :  { %82 = vmatpush.msra.mxu0 %v60_v2  ;;  %133 = vmatpush.msra.mxu1 %v60_v2 }
  0x11   :  { %83 = vmatpush.msra.mxu0 %v59_v3  ;;  %134 = vmatpush.msra.mxu1 %v59_v3 }
  0x13   :  { %84 = vmatpush.msra.mxu0 %v58_v4  ;;  %135 = vmatpush.msra.mxu1 %v58_v4 }
  0x14   :  { %130 = vmatmul.msk.f32.vlgmr.msra.gmra.mxu0 %vm62_vm1, %v56_v5  ;;  %131 = vmatmul.msk.f32.vlgmr.msra.gmra.mxu1 %vm62_vm1, %v57_v6  ;;  %v54_v7 = vld [vmem:[#allocation2] sm:$0xff] }
  0x15   :  { %v55_v8 = vld [vmem:[#allocation2 + $0x8] sm:$0xff] }
  0x91   :  { %v86_v9 = vpop.f32.mrf.mxu0  ;;  %v89_v10 = vpop.f32.mrf.mxu1 }
  0x92   :  { %v92_v11 = vadd.f32 %v86_v9, %v54_v7  ;;  %v93_v12 = vadd.f32 %v89_v10, %v55_v8 }
  0x94   :  { %95 = vst.msk [vmem:[#allocation2] sm:$0xff] %vm51_vm0, %v92_v11 }
  0x95   :  { %96 = vst.msk [vmem:[#allocation2 + $0x8] sm:$0xff] %vm51_vm0, %v93_v12 }
  0x9b   :  { %v100_v14 = vld [vmem:[#allocation2] sm:$0xff] }
  0x9c   :  { %v101_v15 = vld [vmem:[#allocation2 + $0x8] sm:$0xff]  ;;  %v106_v16 = vadd.f32 %v142_v13, %v100_v14 }
  0x9d   :  { %v107_v17 = vadd.f32 %v142_v13, %v101_v15 }
  0x9e   :  { %108 = vst.msk [vmem:[#allocation8] sm:$0xff] %vm51_vm0, %v106_v16 }
  0x9f   :  { %109 = vst.msk [vmem:[#allocation8 + $0x8] sm:$0xff] %vm51_vm0, %v107_v17 }
  0xa0   :  { %122 = dma.vmem_to_hbm [thread:$0]  %s115_s25, 256, %s117_s28, [#allocation5], %s222_s20, %s222_s20, %s223_s21  }
  0xa1   :  { %219 = dma.done.wait [#allocation5], 256  }
  0xa2   :  { %220 = vsyncadd [#allocation5], 4294967040 }
  0xa3   :  { %127 = vsyncpa [#allocation4], 1 }
  0xa4   :  { %128 = vsyncpa [#allocation7], 1 }
  0xa5   :  { %129 = vsyncpa [#allocation5], 1 }

</bundles_post_ra>
